<compile_context>
chip_gen: v7x
topology: tpu7x:2x2x1
jax: 0.10.0
libtpu: 0.0.40
codegen_flags: <defaults>
</compile_context>

<pallas_src>
import functools

import jax
import jax.numpy as jnp
from jax.experimental import pallas as pl
from jax.experimental.pallas import tpu as pltpu

_G = 8          # batch elements packed per row
_HIDDEN = 32


def _value_net_kernel(x_ref, w1_ref, b1_ref, w2_ref, b2_ref, w3_ref, b3_ref,
                      out_ref, *, compute_dtype):
    """One batch tile.

    x_ref  : [TR, G*S]   packed inputs (row r = 8 consecutive batch elements)
    w1_ref : [G*S, G*H]  blockdiag(w1.T x G)   (compute_dtype)
    w2_ref : [G*H, G*H]  blockdiag(w2.T x G)   (compute_dtype)
    w3_ref : [G*H, G]    blockdiag(w3.T x G)   (compute_dtype)
    b*_ref : [1, G*H] / [1, G]  biases tiled G times (float32)
    out_ref: [TR, G]     values of the 8 packed batch elements per row
    """
    x = x_ref[...].astype(compute_dtype)
    z1 = jnp.dot(x, w1_ref[...], preferred_element_type=jnp.float32) + b1_ref[...]
    h1 = jnp.tanh(z1.astype(compute_dtype))          # lane-dense [TR, 256] tanh
    z2 = jnp.dot(h1, w2_ref[...], preferred_element_type=jnp.float32) + b2_ref[...]
    h2 = jnp.tanh(z2.astype(compute_dtype))
    v = jnp.dot(h2, w3_ref[...], preferred_element_type=jnp.float32) + b3_ref[...]
    out_ref[...] = v.astype(out_ref.dtype)


def _block_diag_t(w, g):
    """[out,in] (PyTorch layout) weight -> [g*in, g*out] block-diag of w.T."""
    out_f, in_f = w.shape
    e = jnp.einsum("ag,io->aigo", jnp.eye(g, dtype=w.dtype), w.T)
    return e.reshape(g * in_f, g * out_f)


def _choose_tile_rows(rows, cap_rows):
    if rows <= _G:
        return rows                       # single tiny block (dims == full dims)
    target = pl.cdiv(rows, 2)             # >= 2 tiles so v7x's 2 TCs share work
    target = ((target + _G - 1) // _G) * _G
    return max(_G, min(cap_rows, target))


def preferred_compute_dtype():
    """bf16 tanh/MXU path on chips with a bf16 EUP (v6e/v7x); f32 on v5e."""
    try:
        kind = jax.devices()[0].device_kind.lower()
    except Exception:
        return jnp.float32
    if "v5 lite" in kind or "v5e" in kind or "v5litepod" in kind:
        return jnp.float32
    return jnp.bfloat16


@functools.partial(jax.jit, static_argnames=("compute_dtype", "tile_rows_cap"))
def value_network_forward(x, params, *, compute_dtype=jnp.float32,
                          tile_rows_cap=2048):
    """x: [B, state_size] float32, params in PyTorch layout.  Returns [B, 1]."""
    w1, b1, w2, b2, w3, b3 = params
    B, S = x.shape
    H = w1.shape[0]                       # 32

    # Pack 8 batch elements per row.  For B % 8 == 0 this reshape is a free
    # bitcast (row-major); otherwise a single pad copy is needed.  An upstream
    # producer that can emit the packed [B/8, 8*S] (or bf16) layout directly
    # avoids even that.
    if B % _G:
        x = jnp.pad(x, ((0, _G - B % _G), (0, 0)))
    rows = x.shape[0] // _G
    xg = x.reshape(rows, _G * S)

    # Tiny one-time weight expansion (<= a few hundred KiB), VMEM-resident.
    w1e = _block_diag_t(w1, _G).astype(compute_dtype)     # [G*S, G*H]
    w2e = _block_diag_t(w2, _G).astype(compute_dtype)     # [G*H, G*H]
    w3e = _block_diag_t(w3, _G).astype(compute_dtype)     # [G*H, G]
    b1e = jnp.tile(b1, _G).reshape(1, _G * H).astype(jnp.float32)
    b2e = jnp.tile(b2, _G).reshape(1, _G * H).astype(jnp.float32)
    b3e = jnp.tile(b3, _G).reshape(1, _G).astype(jnp.float32)

    tile_rows = _choose_tile_rows(rows, tile_rows_cap)
    n_tiles = pl.cdiv(rows, tile_rows)

    resident = lambda a: pl.BlockSpec(a.shape, lambda i: (0, 0))
    kernel = functools.partial(_value_net_kernel, compute_dtype=compute_dtype)

    out = pl.pallas_call(
        kernel,
        out_shape=jax.ShapeDtypeStruct((rows, _G), jnp.float32),
        grid=(n_tiles,),
        in_specs=[
            pl.BlockSpec((tile_rows, _G * S), lambda i: (i, 0)),   # streamed x
            resident(w1e), resident(b1e),
            resident(w2e), resident(b2e),
            resident(w3e), resident(b3e),
        ],
        out_specs=pl.BlockSpec((tile_rows, _G), lambda i: (i, 0)),
        compiler_params=pltpu.CompilerParams(
            dimension_semantics=("parallel",),
            vmem_limit_bytes=32 << 20),
    )(xg, w1e, b1e, w2e, b2e, w3e, b3e)

    return out.reshape(-1)[:B].reshape(B, 1)


def init_params(key, state_size, hidden=_HIDDEN):
    """Deterministic synthetic parameters (PyTorch-style uniform fan-in init,
    PyTorch layout: weights [out, in], biases [out])."""
    ks = jax.random.split(key, 6)

    def lin(kw, kb, fan_in, fan_out):
        bound = 1.0 / jnp.sqrt(jnp.float32(fan_in))
        w = jax.random.uniform(kw, (fan_out, fan_in), jnp.float32, -bound, bound)
        b = jax.random.uniform(kb, (fan_out,), jnp.float32, -bound, bound)
        return w, b

    w1, b1 = lin(ks[0], ks[1], state_size, hidden)
    w2, b2 = lin(ks[2], ks[3], hidden, hidden)
    w3, b3 = lin(ks[4], ks[5], hidden, 1)
    return (w1, b1, w2, b2, w3, b3)


def _reference(x, params):
    w1, b1, w2, b2, w3, b3 = params
    h1 = jnp.tanh(x @ w1.T + b1)
    h2 = jnp.tanh(h1 @ w2.T + b2)
    return h2 @ w3.T + b3


if __name__ == "__main__":
    key = jax.random.PRNGKey(0)
    k_x, k_x2, k_p = jax.random.split(key, 3)

    state_size = 16                      # small walking-robot observation dim
    params = init_params(k_p, state_size)

    # Note: default-precision f32 matmuls on the TPU MXU are bf16-pass based,
    # so kernel vs jnp-reference carry ~1e-3 relative rounding each; the f32
    # tolerance below reflects that (real packing/indexing bugs are O(1)).
    x_small = jax.random.normal(k_x, (8, state_size), jnp.float32)
    v_small = jax.block_until_ready(
        value_network_forward(x_small, params, compute_dtype=jnp.float32))
    ref_small = _reference(x_small, params)
    assert v_small.shape == (8, 1)
    assert jnp.allclose(v_small, ref_small, atol=2e-2, rtol=2e-2)

    # Ragged multi-tile batch: exercises the pad path, the 2-tile grid and the
    # masked tail block.
    x_big = jax.random.normal(k_x2, (300, state_size), jnp.float32)
    v_big = jax.block_until_ready(
        value_network_forward(x_big, params, compute_dtype=jnp.float32))
    ref_big = _reference(x_big, params)
    assert v_big.shape == (300, 1)
    assert jnp.allclose(v_big, ref_big, atol=2e-2, rtol=2e-2)

    # bf16 compute path (EUP tanh + bf16 MXU inputs) -- the v6e/v7x fast path.
    v_bf16 = jax.block_until_ready(
        value_network_forward(x_big, params, compute_dtype=jnp.bfloat16))
    assert v_bf16.shape == (300, 1)
    assert jnp.allclose(v_bf16, ref_big, atol=1e-1, rtol=1e-1)

    print("KERNEL_OK")
</pallas_src>

<mosaic_0001>
module attributes {stable_mosaic.version = 11 : i64} {
  func.func @_value_net_kernel(%arg0: i32, %arg1: memref<1x128xf32, #tpu.memory_space<vmem>>, %arg2: memref<128x256xf32, #tpu.memory_space<vmem>>, %arg3: memref<1x256xf32, #tpu.memory_space<vmem>>, %arg4: memref<256x256xf32, #tpu.memory_space<vmem>>, %arg5: memref<1x256xf32, #tpu.memory_space<vmem>>, %arg6: memref<256x8xf32, #tpu.memory_space<vmem>>, %arg7: memref<1x8xf32, #tpu.memory_space<vmem>>, %arg8: memref<1x8xf32, #tpu.memory_space<vmem>>) attributes {dimension_semantics = [#tpu.dimension_semantics<parallel>], iteration_bounds = array<i64: 1>, scalar_prefetch = 0 : i64, scratch_operands = 0 : i64, tpu.core_type = #tpu.core_type<tc>, window_params = [{transform_indices = @transform_0, window_bounds = array<i64: 1, 128>}, {pipeline_mode = #tpu.pipeline_mode<synchronous>, transform_indices = @transform_1, window_bounds = array<i64: 128, 256>}, {pipeline_mode = #tpu.pipeline_mode<synchronous>, transform_indices = @transform_2, window_bounds = array<i64: 1, 256>}, {pipeline_mode = #tpu.pipeline_mode<synchronous>, transform_indices = @transform_3, window_bounds = array<i64: 256, 256>}, {pipeline_mode = #tpu.pipeline_mode<synchronous>, transform_indices = @transform_4, window_bounds = array<i64: 1, 256>}, {pipeline_mode = #tpu.pipeline_mode<synchronous>, transform_indices = @transform_5, window_bounds = array<i64: 256, 8>}, {pipeline_mode = #tpu.pipeline_mode<synchronous>, transform_indices = @transform_6, window_bounds = array<i64: 1, 8>}, {transform_indices = @transform_7, window_bounds = array<i64: 1, 8>}]} {
    %c0 = arith.constant 0 : index
    %c0_0 = arith.constant 0 : index
    %0 = vector.load %arg1[%c0, %c0_0] : memref<1x128xf32, #tpu.memory_space<vmem>>, vector<1x128xf32>
    %c0_1 = arith.constant 0 : index
    %c0_2 = arith.constant 0 : index
    %1 = vector.load %arg2[%c0_1, %c0_2] : memref<128x256xf32, #tpu.memory_space<vmem>>, vector<128x256xf32>
    %cst = arith.constant dense<0.000000e+00> : vector<1x256xf32>
    %2 = tpu.matmul %0, %1, %cst {dimension_numbers = #tpu.dot_dimension_numbers<[1], [0], [0], [1], [0, 0, 1, 1], [], []>} : vector<1x128xf32>, vector<128x256xf32>, vector<1x256xf32> -> vector<1x256xf32>
    %c0_3 = arith.constant 0 : index
    %c0_4 = arith.constant 0 : index
    %3 = vector.load %arg3[%c0_3, %c0_4] : memref<1x256xf32, #tpu.memory_space<vmem>>, vector<1x256xf32>
    %4 = arith.addf %2, %3 : vector<1x256xf32>
    %5 = math.tanh %4 : vector<1x256xf32>
    %c0_5 = arith.constant 0 : index
    %c0_6 = arith.constant 0 : index
    %6 = vector.load %arg4[%c0_5, %c0_6] : memref<256x256xf32, #tpu.memory_space<vmem>>, vector<256x256xf32>
    %cst_7 = arith.constant dense<0.000000e+00> : vector<1x256xf32>
    %7 = tpu.matmul %5, %6, %cst_7 {dimension_numbers = #tpu.dot_dimension_numbers<[1], [0], [0], [1], [0, 0, 1, 1], [], []>} : vector<1x256xf32>, vector<256x256xf32>, vector<1x256xf32> -> vector<1x256xf32>
    %c0_8 = arith.constant 0 : index
    %c0_9 = arith.constant 0 : index
    %8 = vector.load %arg5[%c0_8, %c0_9] : memref<1x256xf32, #tpu.memory_space<vmem>>, vector<1x256xf32>
    %9 = arith.addf %7, %8 : vector<1x256xf32>
    %10 = math.tanh %9 : vector<1x256xf32>
    %c0_10 = arith.constant 0 : index
    %c0_11 = arith.constant 0 : index
    %11 = vector.load %arg6[%c0_10, %c0_11] : memref<256x8xf32, #tpu.memory_space<vmem>>, vector<256x8xf32>
    %cst_12 = arith.constant dense<0.000000e+00> : vector<1x8xf32>
    %12 = tpu.matmul %10, %11, %cst_12 {dimension_numbers = #tpu.dot_dimension_numbers<[1], [0], [0], [1], [0, 0, 1, 1], [], []>} : vector<1x256xf32>, vector<256x8xf32>, vector<1x8xf32> -> vector<1x8xf32>
    %c0_13 = arith.constant 0 : index
    %c0_14 = arith.constant 0 : index
    %13 = vector.load %arg7[%c0_13, %c0_14] : memref<1x8xf32, #tpu.memory_space<vmem>>, vector<1x8xf32>
    %14 = arith.addf %12, %13 : vector<1x8xf32>
    %c0_15 = arith.constant 0 : index
    %c0_16 = arith.constant 0 : index
    %15 = vector.load %arg8[%c0_15, %c0_16] : memref<1x8xf32, #tpu.memory_space<vmem>>, vector<1x8xf32>
    tpu.vector_store %arg8[%c0_15, %c0_16], %14 {strides = array<i32>} : memref<1x8xf32, #tpu.memory_space<vmem>>, vector<1x8xf32>,
    return
  }
  func.func @transform_0(%arg0: i32) -> (i32, i32) {
    %c0_i32 = arith.constant 0 : i32
    %c0_i32_0 = arith.constant 0 : i32
    return %arg0, %c0_i32 : i32, i32
  }
  func.func @transform_1(%arg0: i32) -> (i32, i32) {
    %c0_i32 = arith.constant 0 : i32
    %c0_i32_0 = arith.constant 0 : i32
    %c0_i32_1 = arith.constant 0 : i32
    return %c0_i32, %c0_i32_0 : i32, i32
  }
  func.func @transform_2(%arg0: i32) -> (i32, i32) {
    %c0_i32 = arith.constant 0 : i32
    %c0_i32_0 = arith.constant 0 : i32
    %c0_i32_1 = arith.constant 0 : i32
    return %c0_i32, %c0_i32_0 : i32, i32
  }
  func.func @transform_3(%arg0: i32) -> (i32, i32) {
    %c0_i32 = arith.constant 0 : i32
    %c0_i32_0 = arith.constant 0 : i32
    %c0_i32_1 = arith.constant 0 : i32
    return %c0_i32, %c0_i32_0 : i32, i32
  }
  func.func @transform_4(%arg0: i32) -> (i32, i32) {
    %c0_i32 = arith.constant 0 : i32
    %c0_i32_0 = arith.constant 0 : i32
    %c0_i32_1 = arith.constant 0 : i32
    return %c0_i32, %c0_i32_0 : i32, i32
  }
  func.func @transform_5(%arg0: i32) -> (i32, i32) {
    %c0_i32 = arith.constant 0 : i32
    %c0_i32_0 = arith.constant 0 : i32
    %c0_i32_1 = arith.constant 0 : i32
    return %c0_i32, %c0_i32_0 : i32, i32
  }
  func.func @transform_6(%arg0: i32) -> (i32, i32) {
    %c0_i32 = arith.constant 0 : i32
    %c0_i32_0 = arith.constant 0 : i32
    %c0_i32_1 = arith.constant 0 : i32
    return %c0_i32, %c0_i32_0 : i32, i32
  }
  func.func @transform_7(%arg0: i32) -> (i32, i32) {
    %c0_i32 = arith.constant 0 : i32
    %c0_i32_0 = arith.constant 0 : i32
    return %arg0, %c0_i32 : i32, i32
  }
}

</mosaic_0001>

<bundles_post_ra>
// kernel: tile.18
= control target key start
LH: loop header
LB: loop body
LE: loop exit
PB: predicated region body
PF: predicated region fallthrough
CT: control target
= control target key end

     0   :  { %s22_s0 = inlined_call_operand.vmem [shape: f32[32], index: 0, kind: input, shape index: {}]   ;;  %s23_s1 = inlined_call_operand.vmem [shape: f32[8,32], index: 1, kind: output, shape index: {}]  }
   0x1   :  { %v4_v0 = vld [vmem:[%s22_s0] ss:$0 sm:$0xff] }
   0x2   :  { %5 = vst [vmem:[%s23_s1] sm:$0xff] %v4_v0 }

// kernel: tile.19
= control target key start
LH: loop header
LB: loop body
LE: loop exit
PB: predicated region body
PF: predicated region fallthrough
CT: control target
= control target key end

     0   :  { %s7_s6 = smov 3  ;;  %s14_s9 = smov 3  ;;  %vm4_vm0 = vcmask 261120   ;;  %vm11_vm1 = vcmask 1048320   ;;  %vm18_vm2 = vcmask 785920   ;;  %vm25_vm3 = vcmask 523520   ;;  %s76_s0 = inlined_call_operand.vmem [shape: f32[8,32], index: 0, kind: input, shape index: {}]   ;;  %s77_s1 = inlined_call_operand.vmem [shape: f32[1,256], index: 1, kind: output, shape index: {}]  }
   0x1   :  { %v38_v0 = vld [vmem:[%s76_s0 + $0x3] ss:$4 sm:%s7_s6]   ;;  %s45_s10 = smov 96   ;;  %s21_s11 = smov 3  ;;  %v39_v1 = vld [vmem:[%s76_s0 + $0x2] ss:$4 sm:%s14_s9]  }
   0x2   :  { %9 = vrot.lane.b32.xlu0 %v38_v0, %s45_s10  ;;  %v40_v2 = vld [vmem:[%s76_s0 + $0x1] ss:$4 sm:%s21_s11]   ;;  %s2_s16 = smov 3  ;;  %s46_s17 = smov 32  }
   0x3   :  { %23 = vrot.lane.b32.xlu1 %v40_v2, %s46_s17  ;;  %v3_v3 = vld [vmem:[%s76_s0] ss:$4 sm:%s2_s16]   ;;  %s47_s0 = smov 64  }
   0x4   :  { %5 = vst.msk [vmem:[#allocation0] ss:$8 sm:$0x3] %vm4_vm0, %v3_v3  }
   0x6   :  { %16 = vrot.lane.b32.xlu0 %v39_v1, %s47_s0 }
  0x74   :  { %v10_v4 = vpop.permute.xlu0 %9  }
  0x75   :  { %12 = vst.msk [vmem:[#allocation0] ss:$8 sm:$0x3] %vm11_vm1, %v10_v4   ;;  %v24_v5 = vpop.permute.xlu1 %23  }
  0x78   :  { %v17_v6 = vpop.permute.xlu0 %16  }
  0x79   :  { %19 = vst.msk [vmem:[#allocation0] ss:$8 sm:$0x3] %vm18_vm2, %v17_v6  }
  0x7a   :  { %26 = vst.msk [vmem:[#allocation0] ss:$8 sm:$0x3] %vm25_vm3, %v24_v5  }
  0x81   :  { %v30_v7 = vld [vmem:[#allocation0] sm:$0x1]  ;;  %v34_v8 = vld [vmem:[#allocation0 + $0x8] sm:$0x1] }
  0x82   :  { %32 = vst [vmem:[%s77_s1] sm:$0x1] %v30_v7  ;;  %41 = vst [vmem:[%s77_s1 + $0x1] sm:$0x1] %v34_v8 }

// kernel: value_network_forward.1
= control target key start
LH: loop header
LB: loop body
LE: loop exit
PB: predicated region body
PF: predicated region fallthrough
CT: control target
= control target key end

     0   :  { %v610_v7 = vmov 0.0   ;;  %s1060_s0 = inlined_call_operand.vmem [shape: f32[1,128], index: 0, kind: input, shape index: {}]   ;;  %s1061_s1 = inlined_call_operand.vmem [shape: f32[128,256], index: 1, kind: input, shape index: {}]   ;;  %s1062_s2 = inlined_call_operand.vmem [shape: f32[1,256], index: 2, kind: input, shape index: {}]   ;;  %s1063_s3 = inlined_call_operand.vmem [shape: f32[256,256], index: 3, kind: input, shape index: {}]   ;;  %s1064_s4 = inlined_call_operand.vmem [shape: f32[1,256], index: 4, kind: input, shape index: {}]   ;;  %s1065_s5 = inlined_call_operand.vmem [shape: f32[256,8], index: 5, kind: input, shape index: {}]   ;;  %s1066_s6 = inlined_call_operand.vmem [shape: f32[1,8], index: 6, kind: input, shape index: {}]   ;;  %s1067_s7 = inlined_call_operand.hbm [shape: f32[1,8], index: 7, kind: output, shape index: {}]  }
   0x1   :  { %v29_v0 = vld [vmem:[%s1061_s1 + $0x8] sm:$0xff]  ;;  %v31_v1 = vld [vmem:[%s1061_s1 + $0x18] sm:$0xff]  ;;  %v28_v2 = vld [vmem:[%s1061_s1] sm:$0xff]  ;;  %136 = vmatprep.mubr.f32.mxu0 %v610_v7 }
   0x2   :  { %v448_v3 = vpack.c.bf16 %v31_v1, %v29_v0  ;;  %v30_v4 = vld [vmem:[%s1061_s1 + $0x10] sm:$0xff]  ;;  %v33_v5 = vld [vmem:[%s1061_s1 + $0x28] sm:$0xff]  ;;  %v35_v6 = vld [vmem:[%s1061_s1 + $0x38] sm:$0xff] }
   0x3   :  { %v450_v8 = vpack.c.bf16 %v30_v4, %v28_v2  ;;  %v452_v9 = vpack.c.bf16 %v35_v6, %v33_v5  ;;  %v32_v10 = vld [vmem:[%s1061_s1 + $0x20] sm:$0xff]  ;;  %v34_v11 = vld [vmem:[%s1061_s1 + $0x30] sm:$0xff]  ;;  %v37_v12 = vld [vmem:[%s1061_s1 + $0x48] sm:$0xff] }
   0x4   :  { %449 = vmatprep.subr.bf16.mxu0 %v448_v3  ;;  %v39_v13 = vld [vmem:[%s1061_s1 + $0x58] sm:$0xff]  ;;  %v454_v14 = vpack.c.bf16 %v34_v11, %v32_v10  ;;  %v36_v16 = vld [vmem:[%s1061_s1 + $0x40] sm:$0xff]  ;;  %v38_v17 = vld [vmem:[%s1061_s1 + $0x50] sm:$0xff] }
   0x5   :  { %451 = vmatpush1.bf16.msra.mxu0 %v450_v8  ;;  %v456_v15 = vpack.c.bf16 %v39_v13, %v37_v12  ;;  %v41_v18 = vld [vmem:[%s1061_s1 + $0x68] sm:$0xff]  ;;  %v43_v19 = vld [vmem:[%s1061_s1 + $0x78] sm:$0xff]  ;;  %v458_v20 = vpack.c.bf16 %v38_v17, %v36_v16  ;;  %v40_v22 = vld [vmem:[%s1061_s1 + $0x60] sm:$0xff] }
   0x6   :  { %453 = vmatprep.subr.bf16.mxu0 %v452_v9  ;;  %v460_v21 = vpack.c.bf16 %v43_v19, %v41_v18  ;;  %v42_v23 = vld [vmem:[%s1061_s1 + $0x70] sm:$0xff]  ;;  %v45_v24 = vld [vmem:[%s1061_s1 + $0x88] sm:$0xff]  ;;  %v47_v25 = vld [vmem:[%s1061_s1 + $0x98] sm:$0xff] }
   0x7   :  { %v44_v26 = vld [vmem:[%s1061_s1 + $0x80] sm:$0xff]  ;;  %v46_v27 = vld [vmem:[%s1061_s1 + $0x90] sm:$0xff]  ;;  %v146_v28 = vld [vmem:[%s1063_s3 + $0x8] sm:$0xff]  ;;  %v462_v31 = vpack.c.bf16 %v42_v23, %v40_v22  ;;  %v464_v36 = vpack.c.bf16 %v47_v25, %v45_v24 }
   0x8   :  { %v148_v29 = vld [vmem:[%s1063_s3 + $0x18] sm:$0xff]  ;;  %v145_v30 = vld [vmem:[%s1063_s3] sm:$0xff]  ;;  %v147_v33 = vld [vmem:[%s1063_s3 + $0x10] sm:$0xff]  ;;  %v466_v46 = vpack.c.bf16 %v46_v27, %v44_v26 }
   0x9   :  { %455 = vmatpush1.bf16.msra.mxu0 %v454_v14  ;;  %v480_v32 = vpack.c.bf16 %v148_v29, %v146_v28  ;;  %v150_v34 = vld [vmem:[%s1063_s3 + $0x28] sm:$0xff]  ;;  %v152_v35 = vld [vmem:[%s1063_s3 + $0x38] sm:$0xff]  ;;  %v482_v37 = vpack.c.bf16 %v147_v33, %v145_v30  ;;  %v149_v39 = vld [vmem:[%s1063_s3 + $0x20] sm:$0xff] }
   0xa   :  { %457 = vmatprep.subr.bf16.mxu0 %v456_v15  ;;  %v484_v38 = vpack.c.bf16 %v152_v35, %v150_v34  ;;  %v151_v40 = vld [vmem:[%s1063_s3 + $0x30] sm:$0xff]  ;;  %v154_v41 = vld [vmem:[%s1063_s3 + $0x48] sm:$0xff]  ;;  %v51_v43 = vld [vmem:[%s1061_s1 + $0xb8] sm:$0xff] }
   0xb   :  { %v49_v42 = vld [vmem:[%s1061_s1 + $0xa8] sm:$0xff]  ;;  %481 = vmatprep.subr.bf16.mxu1 %v480_v32  ;;  %v156_v44 = vld [vmem:[%s1063_s3 + $0x58] sm:$0xff]  ;;  %v486_v45 = vpack.c.bf16 %v151_v40, %v149_v39  ;;  %v48_v47 = vld [vmem:[%s1061_s1 + $0xa0] sm:$0xff] }
   0xc   :  { %483 = vmatpush1.bf16.msra.mxu1 %v482_v37  ;;  %v488_v48 = vpack.c.bf16 %v156_v44, %v154_v41  ;;  %v153_v49 = vld [vmem:[%s1063_s3 + $0x40] sm:$0xff]  ;;  %v155_v50 = vld [vmem:[%s1063_s3 + $0x50] sm:$0xff]  ;;  %v468_v51 = vpack.c.bf16 %v51_v43, %v49_v42  ;;  %v158_v53 = vld [vmem:[%s1063_s3 + $0x68] sm:$0xff] }
   0xd   :  { %459 = vmatpush1.bf16.msra.mxu0 %v458_v20  ;;  %485 = vmatprep.subr.bf16.mxu1 %v484_v38  ;;  %v50_v52 = vld [vmem:[%s1061_s1 + $0xb0] sm:$0xff]  ;;  %v160_v54 = vld [vmem:[%s1063_s3 + $0x78] sm:$0xff]  ;;  %v53_v55 = vld [vmem:[%s1061_s1 + $0xc8] sm:$0xff]  ;;  %v490_v57 = vpack.c.bf16 %v155_v50, %v153_v49 }
   0xe   :  { %461 = vmatprep.subr.bf16.mxu0 %v460_v21  ;;  %v55_v56 = vld [vmem:[%s1061_s1 + $0xd8] sm:$0xff]  ;;  %v470_v58 = vpack.c.bf16 %v50_v52, %v48_v47  ;;  %v52_v59 = vld [vmem:[%s1061_s1 + $0xc0] sm:$0xff]  ;;  %v492_v60 = vpack.c.bf16 %v160_v54, %v158_v53  ;;  %v159_v62 = vld [vmem:[%s1063_s3 + $0x70] sm:$0xff] }
   0xf   :  { %v157_v61 = vld [vmem:[%s1063_s3 + $0x60] sm:$0xff]  ;;  %v472_v63 = vpack.c.bf16 %v55_v56, %v53_v55  ;;  %v54_v0 = vld [vmem:[%s1061_s1 + $0xd0] sm:$0xff]  ;;  %v162_v1 = vld [vmem:[%s1063_s3 + $0x88] sm:$0xff] }
  0x10   :  { %487 = vmatpush1.bf16.msra.mxu1 %v486_v45  ;;  %v164_v2 = vld [vmem:[%s1063_s3 + $0x98] sm:$0xff]  ;;  %v57_v3 = vld [vmem:[%s1061_s1 + $0xe8] sm:$0xff]  ;;  %v494_v5 = vpack.c.bf16 %v159_v62, %v157_v61  ;;  %v474_v6 = vpack.c.bf16 %v54_v0, %v52_v59  ;;  %v56_v7 = vld [vmem:[%s1061_s1 + $0xe0] sm:$0xff] }
  0x11   :  { %463 = vmatpush1.bf16.msra.mxu0 %v462_v31  ;;  %489 = vmatprep.subr.bf16.mxu1 %v488_v48  ;;  %v59_v4 = vld [vmem:[%s1061_s1 + $0xf8] sm:$0xff]  ;;  %v496_v8 = vpack.c.bf16 %v164_v2, %v162_v1  ;;  %v161_v9 = vld [vmem:[%s1063_s3 + $0x80] sm:$0xff]  ;;  %v163_v10 = vld [vmem:[%s1063_s3 + $0x90] sm:$0xff] }
  0x12   :  { %465 = vmatprep.subr.bf16.mxu0 %v464_v36  ;;  %v476_v11 = vpack.c.bf16 %v59_v4, %v57_v3  ;;  %v58_v12 = vld [vmem:[%s1061_s1 + $0xf0] sm:$0xff]  ;;  %v166_v13 = vld [vmem:[%s1063_s3 + $0xa8] sm:$0xff]  ;;  %v168_v14 = vld [vmem:[%s1063_s3 + $0xb8] sm:$0xff]  ;;  %v498_v15 = vpack.c.bf16 %v163_v10, %v161_v9 }
  0x14   :  { %491 = vmatpush1.bf16.msra.mxu1 %v490_v57 }
  0x15   :  { %467 = vmatpush1.bf16.msra.mxu0 %v466_v46  ;;  %493 = vmatprep.subr.bf16.mxu1 %v492_v60 }
  0x16   :  { %469 = vmatprep.subr.bf16.mxu0 %v468_v51 }
  0x18   :  { %495 = vmatpush1.bf16.msra.mxu1 %v494_v5 }
  0x19   :  { %471 = vmatpush1.bf16.msra.mxu0 %v470_v58 }
  0x1a   :  { %473 = vmatprep.subr.bf16.mxu0 %v472_v63 }
  0x1b   :  { %12 = vsyncpa [#allocation3], 0  ;;  %v478_v16 = vpack.c.bf16 %v58_v12, %v56_v7  ;;  %497 = vmatprep.subr.bf16.mxu1 %v496_v8  ;;  %v500_v17 = vpack.c.bf16 %v168_v14, %v166_v13  ;;  %v165_v18 = vld [vmem:[%s1063_s3 + $0xa0] sm:$0xff]  ;;  %v167_v19 = vld [vmem:[%s1063_s3 + $0xb0] sm:$0xff]  ;;  %s611_s17 = smov [#allocation2]   ;;  %vm397_vm0 = vcmask 57344  }
  0x1c   :  { %v170_v20 = vld [vmem:[%s1063_s3 + $0xc8] sm:$0xff]  ;;  %v172_v21 = vld [vmem:[%s1063_s3 + $0xd8] sm:$0xff]  ;;  %499 = vmatpush1.bf16.msra.mxu1 %v498_v15  ;;  %v502_v22 = vpack.c.bf16 %v167_v19, %v165_v18  ;;  %v27_v23 = vld [vmem:[%s1060_s0] sm:$0x1] }
  0x1d   :  { %475 = vmatpush1.bf16.msra.mxu0 %v474_v6  ;;  %501 = vmatprep.subr.bf16.mxu1 %v500_v17  ;;  %v504_v24 = vpack.c.bf16 %v172_v21, %v170_v20  ;;  %v169_v25 = vld [vmem:[%s1063_s3 + $0xc0] sm:$0xff]  ;;  %v171_v26 = vld [vmem:[%s1063_s3 + $0xd0] sm:$0xff]  ;;  %v174_v27 = vld [vmem:[%s1063_s3 + $0xe8] sm:$0xff] }
  0x1e   :  { %477 = vmatprep.subr.bf16.mxu0 %v476_v11  ;;  %v176_v28 = vld [vmem:[%s1063_s3 + $0xf8] sm:$0xff]  ;;  %v506_v29 = vpack.c.bf16 %v171_v26, %v169_v25  ;;  %v173_v31 = vld [vmem:[%s1063_s3 + $0xe0] sm:$0xff]  ;;  %v175_v32 = vld [vmem:[%s1063_s3 + $0xf0] sm:$0xff] }
  0x1f   :  { %v508_v30 = vpack.c.bf16 %v176_v28, %v174_v27  ;;  %v178_v33 = vld [vmem:[%s1063_s3 + $0x108] sm:$0xff]  ;;  %v180_v34 = vld [vmem:[%s1063_s3 + $0x118] sm:$0xff]  ;;  %v510_v35 = vpack.c.bf16 %v175_v32, %v173_v31  ;;  %v177_v37 = vld [vmem:[%s1063_s3 + $0x100] sm:$0xff] }
  0x20   :  { %503 = vmatpush1.bf16.msra.mxu1 %v502_v22  ;;  %v512_v36 = vpack.c.bf16 %v180_v34, %v178_v33  ;;  %v179_v38 = vld [vmem:[%s1063_s3 + $0x110] sm:$0xff]  ;;  %v182_v39 = vld [vmem:[%s1063_s3 + $0x128] sm:$0xff]  ;;  %v184_v40 = vld [vmem:[%s1063_s3 + $0x138] sm:$0xff] }
  0x21   :  { %479 = vmatpush1.bf16.msra.mxu0 %v478_v16  ;;  %505 = vmatprep.subr.bf16.mxu1 %v504_v24  ;;  %v514_v41 = vpack.c.bf16 %v179_v38, %v177_v37  ;;  %v516_v42 = vpack.c.bf16 %v184_v40, %v182_v39  ;;  %v181_v43 = vld [vmem:[%s1063_s3 + $0x120] sm:$0xff]  ;;  %v183_v44 = vld [vmem:[%s1063_s3 + $0x130] sm:$0xff]  ;;  %v186_v45 = vld [vmem:[%s1063_s3 + $0x148] sm:$0xff] }
  0x22   :  { %v188_v46 = vld [vmem:[%s1063_s3 + $0x158] sm:$0xff]  ;;  %v518_v47 = vpack.c.bf16 %v183_v44, %v181_v43  ;;  %v185_v49 = vld [vmem:[%s1063_s3 + $0x140] sm:$0xff]  ;;  %v187_v50 = vld [vmem:[%s1063_s3 + $0x150] sm:$0xff] }
  0x23   :  { %v520_v48 = vpack.c.bf16 %v188_v46, %v186_v45  ;;  %v190_v51 = vld [vmem:[%s1063_s3 + $0x168] sm:$0xff]  ;;  %v192_v52 = vld [vmem:[%s1063_s3 + $0x178] sm:$0xff]  ;;  %v522_v53 = vpack.c.bf16 %v187_v50, %v185_v49  ;;  %v189_v55 = vld [vmem:[%s1063_s3 + $0x160] sm:$0xff] }
  0x24   :  { %137 = vmatmul.mubr.f32.vlgmr.msra.gmra.mrb[0].mxu0 %v27_v23  ;;  %507 = vmatpush1.bf16.msra.mxu1 %v506_v29  ;;  %v524_v54 = vpack.c.bf16 %v192_v52, %v190_v51  ;;  %v191_v56 = vld [vmem:[%s1063_s3 + $0x170] sm:$0xff]  ;;  %v194_v58 = vld [vmem:[%s1063_s3 + $0x188] sm:$0xff]  ;;  %v196_v59 = vld [vmem:[%s1063_s3 + $0x198] sm:$0xff] }
  0x25   :  { %509 = vmatprep.subr.bf16.mxu1 %v508_v30  ;;  %v526_v57 = vpack.c.bf16 %v191_v56, %v189_v55  ;;  %v528_v60 = vpack.c.bf16 %v196_v59, %v194_v58  ;;  %v193_v61 = vld [vmem:[%s1063_s3 + $0x180] sm:$0xff]  ;;  %v195_v62 = vld [vmem:[%s1063_s3 + $0x190] sm:$0xff]  ;;  %v198_v0 = vld [vmem:[%s1063_s3 + $0x1a8] sm:$0xff] }
  0x26   :  { %v530_v63 = vpack.c.bf16 %v195_v62, %v193_v61  ;;  %v200_v1 = vld [vmem:[%s1063_s3 + $0x1b8] sm:$0xff]  ;;  %v197_v3 = vld [vmem:[%s1063_s3 + $0x1a0] sm:$0xff]  ;;  %v199_v4 = vld [vmem:[%s1063_s3 + $0x1b0] sm:$0xff] }
  0x27   :  { %v532_v2 = vpack.c.bf16 %v200_v1, %v198_v0  ;;  %v534_v5 = vpack.c.bf16 %v199_v4, %v197_v3  ;;  %v202_v6 = vld [vmem:[%s1063_s3 + $0x1c8] sm:$0xff]  ;;  %v204_v7 = vld [vmem:[%s1063_s3 + $0x1d8] sm:$0xff]  ;;  %v201_v8 = vld [vmem:[%s1063_s3 + $0x1c0] sm:$0xff] }
  0x28   :  { %511 = vmatpush1.bf16.msra.mxu1 %v510_v35  ;;  %v536_v9 = vpack.c.bf16 %v204_v7, %v202_v6  ;;  %v203_v10 = vld [vmem:[%s1063_s3 + $0x1d0] sm:$0xff]  ;;  %v206_v11 = vld [vmem:[%s1063_s3 + $0x1e8] sm:$0xff]  ;;  %v208_v12 = vld [vmem:[%s1063_s3 + $0x1f8] sm:$0xff] }
  0x29   :  { %513 = vmatprep.subr.bf16.mxu1 %v512_v36  ;;  %v538_v13 = vpack.c.bf16 %v203_v10, %v201_v8  ;;  %v540_v14 = vpack.c.bf16 %v208_v12, %v206_v11  ;;  %v205_v15 = vld [vmem:[%s1063_s3 + $0x1e0] sm:$0xff]  ;;  %v207_v16 = vld [vmem:[%s1063_s3 + $0x1f0] sm:$0xff]  ;;  %v311_v19 = vld [vmem:[%s1065_s5 + $0x88] sm:$0xff] }
  0x2a   :  { %v542_v17 = vpack.c.bf16 %v207_v16, %v205_v15  ;;  %v310_v18 = vld [vmem:[%s1065_s5 + $0x80] sm:$0xff]  ;;  %v295_v22 = vld [vmem:[%s1065_s5 + $0x8] sm:$0xff]  ;;  %v312_v23 = vld [vmem:[%s1065_s5 + $0x90] sm:$0xff] }
  0x2b   :  { %v294_v20 = vld [vmem:[%s1065_s5] sm:$0xff]  ;;  %v544_v21 = vpack.c.bf16 %v311_v19, %v310_v18  ;;  %v313_v24 = vld [vmem:[%s1065_s5 + $0x98] sm:$0xff]  ;;  %v296_v27 = vld [vmem:[%s1065_s5 + $0x10] sm:$0xff] }
  0x2c   :  { %515 = vmatpush1.bf16.msra.mxu1 %v514_v41  ;;  %v546_v25 = vpack.c.bf16 %v295_v22, %v294_v20  ;;  %v548_v26 = vpack.c.bf16 %v313_v24, %v312_v23  ;;  %v297_v28 = vld [vmem:[%s1065_s5 + $0x18] sm:$0xff]  ;;  %v314_v29 = vld [vmem:[%s1065_s5 + $0xa0] sm:$0xff]  ;;  %v315_v30 = vld [vmem:[%s1065_s5 + $0xa8] sm:$0xff] }
  0x2d   :  { %517 = vmatprep.subr.bf16.mxu1 %v516_v42  ;;  %545 = vmatprep.subr.bf16.mxu0 %v544_v21  ;;  %v550_v31 = vpack.c.bf16 %v297_v28, %v296_v27  ;;  %v552_v32 = vpack.c.bf16 %v315_v30, %v314_v29  ;;  %v298_v33 = vld [vmem:[%s1065_s5 + $0x20] sm:$0xff]  ;;  %v299_v34 = vld [vmem:[%s1065_s5 + $0x28] sm:$0xff]  ;;  %v316_v35 = vld [vmem:[%s1065_s5 + $0xb0] sm:$0xff]  ;;  %v62_v42 = vlaneseq }
  0x2e   :  { %547 = vmatpush3.bf16.msra.mxu0 %v546_v25  ;;  %v317_v36 = vld [vmem:[%s1065_s5 + $0xb8] sm:$0xff]  ;;  %v554_v37 = vpack.c.bf16 %v299_v34, %v298_v33  ;;  %v300_v39 = vld [vmem:[%s1065_s5 + $0x30] sm:$0xff]  ;;  %v60_v45 = vld [vmem:[%s1062_s2] sm:$0x3] }
  0x2f   :  { %549 = vmatprep.subr.bf16.mxu0 %v548_v26  ;;  %v556_v38 = vpack.c.bf16 %v317_v36, %v316_v35  ;;  %v301_v40 = vld [vmem:[%s1065_s5 + $0x38] sm:$0xff]  ;;  %v63_v43 = vshrl.u32 %v62_v42, 7  ;;  %v318_v55 = vld [vmem:[%s1065_s5 + $0xc0] sm:$0xff]  ;;  %v319_v56 = vld [vmem:[%s1065_s5 + $0xc8] sm:$0xff] }
  0x30   :  { %519 = vmatpush1.bf16.msra.mxu1 %v518_v47  ;;  %v558_v41 = vpack.c.bf16 %v301_v40, %v300_v39  ;;  %v302_v58 = vld [vmem:[%s1065_s5 + $0x40] sm:$0xff]  ;;  %v303_v59 = vld [vmem:[%s1065_s5 + $0x48] sm:$0xff]  ;;  %v320_v61 = vld [vmem:[%s1065_s5 + $0xd0] sm:$0xff] }
  0x31   :  { %521 = vmatprep.subr.bf16.mxu1 %v520_v48  ;;  %v64_v44 = vsub.s32 0, %v63_v43  ;;  %v68_v46 = vsub.s32 1, %v63_v43  ;;  %v321_v62 = vld [vmem:[%s1065_s5 + $0xd8] sm:$0xff]  ;;  %v304_v0 = vld [vmem:[%s1065_s5 + $0x50] sm:$0xff]  ;;  %v322_v3 = vld [vmem:[%s1065_s5 + $0xe0] sm:$0xff] }
  0x32   :  { %551 = vmatpush3.bf16.msra.mxu0 %v550_v31  ;;  %v305_v1 = vld [vmem:[%s1065_s5 + $0x58] sm:$0xff]  ;;  %v323_v4 = vld [vmem:[%s1065_s5 + $0xe8] sm:$0xff]  ;;  %v324_v8 = vld [vmem:[%s1065_s5 + $0xf0] sm:$0xff] }
  0x33   :  { %553 = vmatprep.subr.bf16.mxu0 %v552_v32  ;;  %v65_v47 = vrot.slane %v60_v45, %v64_v44  ;;  %v69_v48 = vrot.slane %v60_v45, %v68_v46  ;;  %v568_v6 = vpack.c.bf16 %v323_v4, %v322_v3  ;;  %v307_v7 = vld [vmem:[%s1065_s5 + $0x68] sm:$0xff]  ;;  %v308_v12 = vld [vmem:[%s1065_s5 + $0x70] sm:$0xff]  ;;  %v209_v15 = vld [vmem:[%s1064_s4] sm:$0x3]  ;;  %s405_s4 = sshll.u32 %s611_s17, 4  ;;  %s406_s4 = int_to_ptr.vmem [resolvable:$true] %s405_s4 }
  0x34   :  { %523 = vmatpush1.bf16.msra.mxu1 %v522_v53  ;;  %v214_v16 = vrot.slane %v209_v15, %v64_v44  ;;  %v326_v25 = vld [vmem:[%s1066_s6] sm:$0x1]  ;;  %s586_s18 = scalar_lea.vmem %s406_s4, 16  ;;  %s590_s1 = scalar_lea.vmem %s406_s4, 32 }
  0x35   :  { %525 = vmatprep.subr.bf16.mxu1 %v524_v54  ;;  %p587_p0 = scmp.ne.s32.totalorder %s406_s4, %s586_s18  ;;  %p591_p1 = scmp.lt.s32.totalorder %s406_s4, %s406_s4 }
  0x36   :  { %555 = vmatpush3.bf16.msra.mxu0 %v554_v37  ;;  %p592_p2 = scmp.lt.s32.totalorder %s590_s1, %s586_s18 }
  0x37   :  { %557 = vmatprep.subr.bf16.mxu0 %v556_v38 }
  0x38   :  { %527 = vmatpush1.bf16.msra.mxu1 %v526_v57  ;;  %v560_v57 = vpack.c.bf16 %v319_v56, %v318_v55  ;;  %p593_p3 = por %p592_p2, %p591_p1 }
  0x39   :  { %529 = vmatprep.subr.bf16.mxu1 %v528_v60  ;;  %v562_v60 = vpack.c.bf16 %v303_v59, %v302_v58 }
  0x3a   :  { %559 = vmatpush3.bf16.msra.mxu0 %v558_v41  ;;  %p594_p4 = pnand %p593_p3, %p587_p0 }
  0x3b   :  { %561 = vmatprep.subr.bf16.mxu0 %v560_v57 }
  0x3c   :  { %531 = vmatpush1.bf16.msra.mxu1 %v530_v63  ;;  %v564_v63 = vpack.c.bf16 %v321_v62, %v320_v61 }
  0x3d   :  { %533 = vmatprep.subr.bf16.mxu1 %v532_v2  ;;  %v566_v2 = vpack.c.bf16 %v305_v1, %v304_v0 }
  0x3e   :  { %563 = vmatpush3.bf16.msra.mxu0 %v562_v60 }
  0x3f   :  { %565 = vmatprep.subr.bf16.mxu0 %v564_v63 }
  0x40   :  { %535 = vmatpush1.bf16.msra.mxu1 %v534_v5  ;;  %v306_v5 = vld [vmem:[%s1065_s5 + $0x60] sm:$0xff] }
  0x41   :  { %537 = vmatprep.subr.bf16.mxu1 %v536_v9  ;;  %v325_v9 = vld [vmem:[%s1065_s5 + $0xf8] sm:$0xff]  ;;  %v570_v10 = vpack.c.bf16 %v307_v7, %v306_v5 }
  0x42   :  { %567 = vmatpush3.bf16.msra.mxu0 %v566_v2  ;;  %v572_v11 = vpack.c.bf16 %v325_v9, %v324_v8 }
  0x43   :  { %569 = vmatprep.subr.bf16.mxu0 %v568_v6 }
  0x44   :  { %539 = vmatpush1.bf16.msra.mxu1 %v538_v13  ;;  %v309_v13 = vld [vmem:[%s1065_s5 + $0x78] sm:$0xff] }
  0x45   :  { %541 = vmatprep.subr.bf16.mxu1 %v540_v14  ;;  %v574_v14 = vpack.c.bf16 %v309_v13, %v308_v12 }
  0x46   :  { %571 = vmatpush3.bf16.msra.mxu0 %v570_v10 }
  0x47   :  { %573 = vmatprep.subr.bf16.mxu0 %v572_v11 }
  0x48   :  { %543 = vmatpush1.bf16.msra.mxu1 %v542_v17  ;;  %v218_v17 = vrot.slane %v209_v15, %v68_v46 }
  0x4a   :  { %575 = vmatpush3.bf16.msra.mxu0 %v574_v14 }
  0xf7   :  { %v138_v49 = vpop.f32.mrb[0].mxu0 }
  0xf8   :  { %v139_v50 = vadd.f32 %v138_v49, %v65_v47  ;;  %v140_v51 = vpop.f32.mrb[1].mxu0 }
  0xf9   :  { %v141_v52 = vadd.f32 %v140_v51, %v69_v48 }
  0xfb   :  { %578 = vtanh.f32 %v141_v52 }
  0xfc   :  { %580 = vtanh.f32 %v139_v50 }
 0x105   :  { %v579_v53 = vpop.eup %578 }
 0x106   :  { %v581_v54 = vpop.eup %580  ;;  %285 = vmatprep.mubr.f32.mxu1 %v579_v53 }
 0x107   :  { %286 = vmatmul.mubr.f32.vlgmr.msra.gmra.mrb[0].mxu1 %v581_v54 }
 0x1da   :  { %v287_v18 = vpop.f32.mrb[0].mxu1 }
 0x1db   :  { %v288_v19 = vadd.f32 %v287_v18, %v214_v16  ;;  %v289_v20 = vpop.f32.mrb[1].mxu1 }
 0x1dc   :  { %v290_v21 = vadd.f32 %v289_v20, %v218_v17 }
 0x1de   :  { %582 = vtanh.f32 %v290_v21 }
 0x1df   :  { %584 = vtanh.f32 %v288_v19 }
 0x1e8   :  { %v583_v22 = vpop.eup %582 }
 0x1e9   :  { %v585_v23 = vpop.eup %584  ;;  %391 = vmatprep.mubr.f32.mxu0 %v583_v22 }
 0x1ea   :  { %392 = vmatmul.mubr.f32.vlgmr.msra.gmra.mrb[2].mxu0 %v585_v23 }
 0x2bd   :  { %v445_v24 = vpop.f32.mrb[2].mxu0 }
 0x2be   :  { %v446_v26 = vpop.f32.mrb[3].mxu0 }
 0x2bf   :  { %v447_v27 = vadd.f32 %v446_v26, %v445_v24 }
 0x2c1   :  { %v394_v28 = vadd.f32 %v447_v27, %v326_v25 }
 0x2c3   :  { %398 = vst.msk [vmem:[#allocation2] sm:$0x1] %vm397_vm0, %v394_v28 }
 0x2c4   :  { %597 = shalt.err (!%p594_p4)
}
 0x2c5   :  { %s598_s6 = scalar_lea.hbm %s1067_s7, 16 }
 0x2c6   :  { %p599_p5 = scmp.ne.s32.totalorder %s1067_s7, %s598_s6  ;;  %p602_p6 = scmp.lt.u32.totalorder %s598_s6, %s1067_s7 }
 0x2c8   :  { %p604_p7 = pnand %p602_p6, %p599_p5 }
 0x2ca   :  { %607 = shalt.err (!%p604_p7)
}
 0x2cb   :  { %408 = dma.vmem_to_hbm [thread:$0]  %s406_s4, 16, %s1067_s7, [#allocation3]  }
 0x2cc   :  { %608 = dma.done.wait [#allocation3], 16  }
 0x2cd   :  { %609 = vsyncadd [#allocation3], 4294967280 }
 0x2ce   :  { %412 = vsyncpa [#allocation3], 1 }

</bundles_post_ra>
